<compile_context>
chip_gen: v5e
topology: v5e:2x2
jax: 0.10.0
libtpu: 0.0.40
codegen_flags: <defaults>
</compile_context>

<pallas_src>
import functools

import jax
import jax.numpy as jnp
from jax import lax
from jax.experimental import pallas as pl
from jax.experimental.pallas import tpu as pltpu


def _round_up(a: int, b: int) -> int:
    return ((a + b - 1) // b) * b


def _vmem_budget_bytes() -> int:
    """Generation-aware VMEM budget (75% of physical), conservative fallback."""
    cap = 64 * 1024 * 1024  # v7x physical per-TC VMEM (worst case)
    try:
        info = pltpu.get_tpu_info()
        cap = int(getattr(info, "vmem_capacity_bytes"))
    except Exception:
        pass
    return (cap * 3) // 4


def _patch_merger_kernel(x_ref, q_ref, g_ref, b_ref, o_ref,
                         m_sc, l_sc, acc_sc,
                         *, eps, n_valid, tn, needs_mask, mm_dtype):
    """One (batch, token-tile) grid step.

    x_ref  : (1, tn, D)  token tile
    q_ref  : (M, D)      pre-scaled queries (queries * D**-0.5), mm_dtype
    g_ref  : (1, D)      LayerNorm weight (f32)
    b_ref  : (1, D)      LayerNorm bias   (f32)
    o_ref  : (1, M, D)   pooled output (resident across the token axis)
    m_sc/l_sc/acc_sc : online-softmax running max / denom / numerator (f32)
    """
    nt = pl.program_id(1)

    @pl.when(nt == 0)
    def _init():
        m_sc[...] = jnp.full_like(m_sc, -jnp.inf)
        l_sc[...] = jnp.zeros_like(l_sc)
        acc_sc[...] = jnp.zeros_like(acc_sc)

    # ---- fused LayerNorm (stats in f32) ----
    x = x_ref[0].astype(jnp.float32)                       # (tn, D)
    if needs_mask:
        # Zero garbage rows of a ragged last tile BEFORE the LN so no Inf/NaN
        # can leak into the p @ xn accumulate.
        row = nt * tn + lax.broadcasted_iota(jnp.int32, (tn, 1), 0)
        x = jnp.where(row < n_valid, x, 0.0)

    mean = jnp.mean(x, axis=-1, keepdims=True)
    xc = x - mean
    var = jnp.mean(xc * xc, axis=-1, keepdims=True)
    inv = lax.rsqrt(var + eps)
    xn = xc * inv * g_ref[...] + b_ref[...]                # (tn, D) f32
    xn_mm = xn.astype(mm_dtype)                            # MXU operand dtype

    # ---- similarity: (q*scale) @ xn^T -> (M, tn), f32 accumulate on the MXU ----
    sim = lax.dot_general(q_ref[...], xn_mm, (((1,), (1,)), ((), ())),
                          preferred_element_type=jnp.float32)
    if needs_mask:
        col = nt * tn + lax.broadcasted_iota(jnp.int32, (1, tn), 1)
        sim = jnp.where(col < n_valid, sim, -jnp.inf)

    # ---- online softmax over the token axis ----
    m_prev = m_sc[...]
    m_new = jnp.maximum(m_prev, sim.max(axis=-1, keepdims=True))
    alpha = jnp.exp(m_prev - m_new)
    p = jnp.exp(sim - m_new)                               # (M, tn) f32
    l_sc[...] = alpha * l_sc[...] + p.sum(axis=-1, keepdims=True)
    acc_sc[...] = alpha * acc_sc[...] + jnp.dot(
        p.astype(mm_dtype), xn_mm, preferred_element_type=jnp.float32)
    m_sc[...] = m_new

    @pl.when(nt == pl.num_programs(1) - 1)
    def _finalize():
        o_ref[0] = (acc_sc[...] * pl.reciprocal(l_sc[...], approx=True)
                    ).astype(o_ref.dtype)


def patch_merger_forward(x, queries, norm_weight, norm_bias,
                         *, eps=1e-5, target_tile_bytes=4 << 20, block_n=None):
    """x: (B, N, D) -> (B, num_tokens_out, D)."""
    B, N, D = x.shape
    M = queries.shape[0]
    scale = float(D) ** -0.5
    mm_dtype = x.dtype
    itemsize = jnp.dtype(x.dtype).itemsize

    vmem_budget = _vmem_budget_bytes()

    # ---- adaptive token tile ----
    if block_n is None:
        # Stream >= ~target_tile_bytes of x per grid step (amortize per-step
        # overhead), then cap by the VMEM budget:
        #   2x double-buffered x tile + ~3 f32 token-wide temporaries
        #   + (M, tn) f32 sim/p, plus fixed headroom.
        tn = _round_up(max(target_tile_bytes // (D * itemsize), 8), 8)
        per_token = 2 * D * itemsize + 3 * D * 4 + 2 * M * 4
        fixed = (4 << 20) + 3 * M * D * 4
        tn_cap = max(8, ((vmem_budget - fixed) // per_token) // 8 * 8)
        tn = min(tn, tn_cap)
    else:
        tn = _round_up(block_n, 8)
    tn = min(tn, _round_up(N, 8))
    n_tiles = pl.cdiv(N, tn)
    needs_mask = (n_tiles * tn != N)

    # Fold the softmax scale into the queries once; keep LN params in f32.
    q_scaled = (queries.astype(jnp.float32) * scale).astype(mm_dtype)
    gamma2 = norm_weight.astype(jnp.float32).reshape(1, D)
    beta2 = norm_bias.astype(jnp.float32).reshape(1, D)

    cost = pl.CostEstimate(
        flops=int(B * (4 * M * N * D + 8 * N * D)),
        transcendentals=int(B * (M * N + N)),
        bytes_accessed=int((B * N * D + M * D + B * M * D) * itemsize),
    )

    kernel = functools.partial(
        _patch_merger_kernel, eps=eps, n_valid=N, tn=tn,
        needs_mask=needs_mask, mm_dtype=mm_dtype)

    out = pl.pallas_call(
        kernel,
        out_shape=jax.ShapeDtypeStruct((B, M, D), x.dtype),
        grid_spec=pltpu.PrefetchScalarGridSpec(
            num_scalar_prefetch=0,
            grid=(B, n_tiles),
            in_specs=[
                pl.BlockSpec((1, tn, D), lambda b, n: (b, n, 0)),   # x tile
                pl.BlockSpec((M, D), lambda b, n: (0, 0)),          # queries*scale
                pl.BlockSpec((1, D), lambda b, n: (0, 0)),          # LN weight
                pl.BlockSpec((1, D), lambda b, n: (0, 0)),          # LN bias
            ],
            out_specs=pl.BlockSpec((1, M, D), lambda b, n: (b, 0, 0)),
            scratch_shapes=[
                pltpu.VMEM((M, 1), jnp.float32),   # running max
                pltpu.VMEM((M, 1), jnp.float32),   # running denom
                pltpu.VMEM((M, D), jnp.float32),   # running numerator
            ],
        ),
        compiler_params=pltpu.CompilerParams(
            dimension_semantics=("parallel", "arbitrary"),
            vmem_limit_bytes=int(vmem_budget),
        ),
        cost_estimate=cost,
    )(x, q_scaled, gamma2, beta2)

    return out


class PatchMerger:
    """JAX mirror of the PyTorch PatchMerger (deterministic synthetic params)."""

    def __init__(self, dim, num_tokens_out, key=None):
        self.dim = int(dim)
        self.num_tokens_out = int(num_tokens_out)
        self.scale = self.dim ** (-0.5)
        if key is None:
            key = jax.random.PRNGKey(0)
        self.queries = jax.random.normal(
            key, (self.num_tokens_out, self.dim), jnp.float32)
        # nn.LayerNorm default init: weight = 1, bias = 0
        self.norm_weight = jnp.ones((self.dim,), jnp.float32)
        self.norm_bias = jnp.zeros((self.dim,), jnp.float32)

    def __call__(self, x):
        return patch_merger_forward(
            x, self.queries, self.norm_weight, self.norm_bias)

    def reference(self, x):
        """Pure-JAX reference for correctness check."""
        xf = x.astype(jnp.float32)
        mean = jnp.mean(xf, axis=-1, keepdims=True)
        var = jnp.mean((xf - mean) ** 2, axis=-1, keepdims=True)
        xn = (xf - mean) / jnp.sqrt(var + 1e-5) * self.norm_weight + self.norm_bias
        sim = jnp.einsum("md,bnd->bmn", self.queries, xn) * self.scale
        attn = jax.nn.softmax(sim, axis=-1)
        return jnp.einsum("bmn,bnd->bmd", attn, xn).astype(x.dtype)


if __name__ == "__main__":
    # Small shapes consistent with the module: B=2, seq=16, dim=32, num_tokens_out=8.
    B, N, dim, num_tokens_out = 2, 16, 32, 8
    key = jax.random.PRNGKey(0)
    k_q, k_x = jax.random.split(key)

    merger = PatchMerger(dim, num_tokens_out, key=k_q)
    x = jax.random.normal(k_x, (B, N, dim), jnp.float32)

    y = merger(x)
    y = jax.block_until_ready(y)

    y_ref = merger.reference(x)
    assert y.shape == (B, num_tokens_out, dim)
    # Tolerance loosened (vs pure-f32) for the approx reciprocal in the finalize
    # (and for bf16 MXU operands when inputs are bf16); still catches real bugs.
    max_err = float(jnp.max(jnp.abs(y - y_ref)))
    assert jnp.allclose(y, y_ref, atol=2e-2, rtol=2e-2), max_err

    print("KERNEL_OK")
</pallas_src>

<mosaic_0001>
module attributes {stable_mosaic.version = 11 : i64} {
  func.func @_patch_merger_kernel(%arg0: i32, %arg1: i32, %arg2: memref<1x16x32xf32, #tpu.memory_space<vmem>>, %arg3: memref<8x32xf32, #tpu.memory_space<vmem>>, %arg4: memref<1x32xf32, #tpu.memory_space<vmem>>, %arg5: memref<1x32xf32, #tpu.memory_space<vmem>>, %arg6: memref<1x8x32xf32, #tpu.memory_space<vmem>>, %arg7: memref<8x1xf32, #tpu.memory_space<vmem>>, %arg8: memref<8x1xf32, #tpu.memory_space<vmem>>, %arg9: memref<8x32xf32, #tpu.memory_space<vmem>>) attributes {dimension_semantics = [#tpu.dimension_semantics<parallel>, #tpu.dimension_semantics<arbitrary>], iteration_bounds = array<i64: 2, 1>, scalar_prefetch = 0 : i64, scratch_operands = 3 : i64, tpu.core_type = #tpu.core_type<tc>, window_params = [{transform_indices = @transform_0, window_bounds = array<i64: 1, 16, 32>}, {pipeline_mode = #tpu.pipeline_mode<synchronous>, transform_indices = @transform_1, window_bounds = array<i64: 8, 32>}, {pipeline_mode = #tpu.pipeline_mode<synchronous>, transform_indices = @transform_2, window_bounds = array<i64: 1, 32>}, {pipeline_mode = #tpu.pipeline_mode<synchronous>, transform_indices = @transform_3, window_bounds = array<i64: 1, 32>}, {transform_indices = @transform_4, window_bounds = array<i64: 1, 8, 32>}]} {
    %c0_i32 = arith.constant 0 : i32
    %0 = arith.cmpi eq, %arg1, %c0_i32 : i32
    %1 = arith.extui %0 : i1 to i32
    %c0_i32_0 = arith.constant 0 : i32
    %2 = arith.cmpi ne, %1, %c0_i32_0 : i32
    scf.if %2 {
      %cst_31 = arith.constant 0xFF800000 : f32
      %54 = vector.broadcast %cst_31 : f32 to vector<8x1xf32>
      %c0_32 = arith.constant 0 : index
      %c0_33 = arith.constant 0 : index
      %55 = vector.load %arg7[%c0_32, %c0_33] : memref<8x1xf32, #tpu.memory_space<vmem>>, vector<8x1xf32>
      tpu.vector_store %arg7[%c0_32, %c0_33], %54 {strides = array<i32>} : memref<8x1xf32, #tpu.memory_space<vmem>>, vector<8x1xf32>,
      %cst_34 = arith.constant 0.000000e+00 : f32
      %56 = vector.broadcast %cst_34 : f32 to vector<8x1xf32>
      %c0_35 = arith.constant 0 : index
      %c0_36 = arith.constant 0 : index
      %57 = vector.load %arg8[%c0_35, %c0_36] : memref<8x1xf32, #tpu.memory_space<vmem>>, vector<8x1xf32>
      tpu.vector_store %arg8[%c0_35, %c0_36], %56 {strides = array<i32>} : memref<8x1xf32, #tpu.memory_space<vmem>>, vector<8x1xf32>,
      %cst_37 = arith.constant 0.000000e+00 : f32
      %58 = vector.broadcast %cst_37 : f32 to vector<8x32xf32>
      %c0_38 = arith.constant 0 : index
      %c0_39 = arith.constant 0 : index
      %59 = vector.load %arg9[%c0_38, %c0_39] : memref<8x32xf32, #tpu.memory_space<vmem>>, vector<8x32xf32>
      tpu.vector_store %arg9[%c0_38, %c0_39], %58 {strides = array<i32>} : memref<8x32xf32, #tpu.memory_space<vmem>>, vector<8x32xf32>,
    } else {
    }
    %c0 = arith.constant 0 : index
    %c0_1 = arith.constant 0 : index
    %c0_2 = arith.constant 0 : index
    %3 = vector.load %arg2[%c0, %c0_1, %c0_2] : memref<1x16x32xf32, #tpu.memory_space<vmem>>, vector<1x16x32xf32>
    %4 = vector.shape_cast %3 : vector<1x16x32xf32> to vector<16x32xf32>
    %cst = arith.constant dense<0.000000e+00> : vector<16xf32>
    %5 = vector.multi_reduction <add>, %4, %cst [1] : vector<16x32xf32> to vector<16xf32>
    %6 = vector.shape_cast %5 : vector<16xf32> to vector<16x1xf32>
    %cst_3 = arith.constant 3.200000e+01 : f32
    %7 = vector.broadcast %cst_3 : f32 to vector<16x1xf32>
    %8 = arith.divf %6, %7 : vector<16x1xf32>
    %9 = vector.broadcast %8 : vector<16x1xf32> to vector<16x32xf32>
    %10 = arith.subf %4, %9 : vector<16x32xf32>
    %11 = arith.mulf %10, %10 : vector<16x32xf32>
    %cst_4 = arith.constant dense<0.000000e+00> : vector<16xf32>
    %12 = vector.multi_reduction <add>, %11, %cst_4 [1] : vector<16x32xf32> to vector<16xf32>
    %13 = vector.shape_cast %12 : vector<16xf32> to vector<16x1xf32>
    %cst_5 = arith.constant 3.200000e+01 : f32
    %14 = vector.broadcast %cst_5 : f32 to vector<16x1xf32>
    %15 = arith.divf %13, %14 : vector<16x1xf32>
    %cst_6 = arith.constant 9.99999974E-6 : f32
    %16 = vector.broadcast %cst_6 : f32 to vector<16x1xf32>
    %17 = arith.addf %15, %16 : vector<16x1xf32>
    %18 = math.rsqrt %17 : vector<16x1xf32>
    %19 = vector.broadcast %18 : vector<16x1xf32> to vector<16x32xf32>
    %20 = arith.mulf %10, %19 : vector<16x32xf32>
    %c0_7 = arith.constant 0 : index
    %c0_8 = arith.constant 0 : index
    %21 = vector.load %arg4[%c0_7, %c0_8] : memref<1x32xf32, #tpu.memory_space<vmem>>, vector<1x32xf32>
    %22 = vector.broadcast %21 : vector<1x32xf32> to vector<16x32xf32>
    %23 = arith.mulf %20, %22 : vector<16x32xf32>
    %c0_9 = arith.constant 0 : index
    %c0_10 = arith.constant 0 : index
    %24 = vector.load %arg5[%c0_9, %c0_10] : memref<1x32xf32, #tpu.memory_space<vmem>>, vector<1x32xf32>
    %25 = vector.broadcast %24 : vector<1x32xf32> to vector<16x32xf32>
    %26 = arith.addf %23, %25 : vector<16x32xf32>
    %c0_11 = arith.constant 0 : index
    %c0_12 = arith.constant 0 : index
    %27 = vector.load %arg3[%c0_11, %c0_12] : memref<8x32xf32, #tpu.memory_space<vmem>>, vector<8x32xf32>
    %cst_13 = arith.constant dense<0.000000e+00> : vector<8x16xf32>
    %28 = tpu.matmul %27, %26, %cst_13 {dimension_numbers = #tpu.dot_dimension_numbers<[1], [1], [0], [0], [0, 0, 1, 0], [], []>} : vector<8x32xf32>, vector<16x32xf32>, vector<8x16xf32> -> vector<8x16xf32>
    %c0_14 = arith.constant 0 : index
    %c0_15 = arith.constant 0 : index
    %29 = vector.load %arg7[%c0_14, %c0_15] : memref<8x1xf32, #tpu.memory_space<vmem>>, vector<8x1xf32>
    %cst_16 = arith.constant dense<0xFF800000> : vector<8xf32>
    %30 = vector.multi_reduction <maximumf>, %28, %cst_16 [1] : vector<8x16xf32> to vector<8xf32>
    %31 = vector.shape_cast %30 : vector<8xf32> to vector<8x1xf32>
    %32 = arith.maximumf %29, %31 : vector<8x1xf32>
    %33 = arith.subf %29, %32 : vector<8x1xf32>
    %34 = math.exp %33 : vector<8x1xf32>
    %35 = vector.broadcast %32 : vector<8x1xf32> to vector<8x16xf32>
    %36 = arith.subf %28, %35 : vector<8x16xf32>
    %37 = math.exp %36 : vector<8x16xf32>
    %c0_17 = arith.constant 0 : index
    %c0_18 = arith.constant 0 : index
    %38 = vector.load %arg8[%c0_17, %c0_18] : memref<8x1xf32, #tpu.memory_space<vmem>>, vector<8x1xf32>
    %39 = arith.mulf %34, %38 : vector<8x1xf32>
    %cst_19 = arith.constant dense<0.000000e+00> : vector<8xf32>
    %40 = vector.multi_reduction <add>, %37, %cst_19 [1] : vector<8x16xf32> to vector<8xf32>
    %41 = vector.shape_cast %40 : vector<8xf32> to vector<8x1xf32>
    %42 = arith.addf %39, %41 : vector<8x1xf32>
    %c0_20 = arith.constant 0 : index
    %c0_21 = arith.constant 0 : index
    %43 = vector.load %arg8[%c0_20, %c0_21] : memref<8x1xf32, #tpu.memory_space<vmem>>, vector<8x1xf32>
    tpu.vector_store %arg8[%c0_20, %c0_21], %42 {strides = array<i32>} : memref<8x1xf32, #tpu.memory_space<vmem>>, vector<8x1xf32>,
    %c0_22 = arith.constant 0 : index
    %c0_23 = arith.constant 0 : index
    %44 = vector.load %arg9[%c0_22, %c0_23] : memref<8x32xf32, #tpu.memory_space<vmem>>, vector<8x32xf32>
    %45 = vector.broadcast %34 : vector<8x1xf32> to vector<8x32xf32>
    %46 = arith.mulf %45, %44 : vector<8x32xf32>
    %cst_24 = arith.constant dense<0.000000e+00> : vector<8x32xf32>
    %47 = tpu.matmul %37, %26, %cst_24 {dimension_numbers = #tpu.dot_dimension_numbers<[1], [0], [0], [1], [0, 0, 1, 1], [], []>} : vector<8x16xf32>, vector<16x32xf32>, vector<8x32xf32> -> vector<8x32xf32>
    %48 = arith.addf %46, %47 : vector<8x32xf32>
    %c0_25 = arith.constant 0 : index
    %c0_26 = arith.constant 0 : index
    %49 = vector.load %arg9[%c0_25, %c0_26] : memref<8x32xf32, #tpu.memory_space<vmem>>, vector<8x32xf32>
    tpu.vector_store %arg9[%c0_25, %c0_26], %48 {strides = array<i32>} : memref<8x32xf32, #tpu.memory_space<vmem>>, vector<8x32xf32>,
    %c0_27 = arith.constant 0 : index
    %c0_28 = arith.constant 0 : index
    %50 = vector.load %arg7[%c0_27, %c0_28] : memref<8x1xf32, #tpu.memory_space<vmem>>, vector<8x1xf32>
    tpu.vector_store %arg7[%c0_27, %c0_28], %32 {strides = array<i32>} : memref<8x1xf32, #tpu.memory_space<vmem>>, vector<8x1xf32>,
    %c0_i32_29 = arith.constant 0 : i32
    %51 = arith.cmpi eq, %arg1, %c0_i32_29 : i32
    %52 = arith.extui %51 : i1 to i32
    %c0_i32_30 = arith.constant 0 : i32
    %53 = arith.cmpi ne, %52, %c0_i32_30 : i32
    scf.if %53 {
      %c0_31 = arith.constant 0 : index
      %c0_32 = arith.constant 0 : index
      %54 = vector.load %arg9[%c0_31, %c0_32] : memref<8x32xf32, #tpu.memory_space<vmem>>, vector<8x32xf32>
      %c0_33 = arith.constant 0 : index
      %c0_34 = arith.constant 0 : index
      %55 = vector.load %arg8[%c0_33, %c0_34] : memref<8x1xf32, #tpu.memory_space<vmem>>, vector<8x1xf32>
      %56 = tpu.reciprocal %55 {approx = true} : vector<8x1xf32> -> vector<8x1xf32>
      %57 = vector.broadcast %56 : vector<8x1xf32> to vector<8x32xf32>
      %58 = arith.mulf %54, %57 : vector<8x32xf32>
      %c0_35 = arith.constant 0 : index
      %c0_36 = arith.constant 0 : index
      %c0_37 = arith.constant 0 : index
      %59 = vector.load %arg6[%c0_35, %c0_36, %c0_37] : memref<1x8x32xf32, #tpu.memory_space<vmem>>, vector<1x8x32xf32>
      %60 = vector.shape_cast %59 : vector<1x8x32xf32> to vector<8x32xf32>
      %61 = vector.shape_cast %58 : vector<8x32xf32> to vector<1x8x32xf32>
      tpu.vector_store %arg6[%c0_35, %c0_36, %c0_37], %61 {strides = array<i32>} : memref<1x8x32xf32, #tpu.memory_space<vmem>>, vector<1x8x32xf32>,
    } else {
    }
    return
  }
  func.func @transform_0(%arg0: i32, %arg1: i32) -> (i32, i32, i32) {
    %c0_i32 = arith.constant 0 : i32
    %c0_i32_0 = arith.constant 0 : i32
    return %arg0, %arg1, %c0_i32 : i32, i32, i32
  }
  func.func @transform_1(%arg0: i32, %arg1: i32) -> (i32, i32) {
    %c0_i32 = arith.constant 0 : i32
    %c0_i32_0 = arith.constant 0 : i32
    %c0_i32_1 = arith.constant 0 : i32
    return %c0_i32, %c0_i32_0 : i32, i32
  }
  func.func @transform_2(%arg0: i32, %arg1: i32) -> (i32, i32) {
    %c0_i32 = arith.constant 0 : i32
    %c0_i32_0 = arith.constant 0 : i32
    %c0_i32_1 = arith.constant 0 : i32
    return %c0_i32, %c0_i32_0 : i32, i32
  }
  func.func @transform_3(%arg0: i32, %arg1: i32) -> (i32, i32) {
    %c0_i32 = arith.constant 0 : i32
    %c0_i32_0 = arith.constant 0 : i32
    %c0_i32_1 = arith.constant 0 : i32
    return %c0_i32, %c0_i32_0 : i32, i32
  }
  func.func @transform_4(%arg0: i32, %arg1: i32) -> (i32, i32, i32) {
    %c0_i32 = arith.constant 0 : i32
    %c0_i32_0 = arith.constant 0 : i32
    %c0_i32_1 = arith.constant 0 : i32
    return %arg0, %c0_i32, %c0_i32_0 : i32, i32, i32
  }
}

</mosaic_0001>

<bundles_post_ra>
// kernel: tpu_custom_call.1
= control target key start
LH: loop header
LB: loop body
LE: loop exit
PB: predicated region body
PF: predicated region fallthrough
CT: control target
= control target key end

     0   :  { %s1005_s0 = inlined_call_operand.hbm [shape: f32[2,16,32], index: 0, kind: input, shape index: {}]   ;;  %s1006_s1 = inlined_call_operand.hbm [shape: f32[8,32], index: 1, kind: input, shape index: {}]   ;;  %s1007_s2 = inlined_call_operand.vmem [shape: f32[1,32], index: 2, kind: input, shape index: {}]   ;;  %s1008_s3 = inlined_call_operand.vmem [shape: f32[1,32], index: 3, kind: input, shape index: {}]   ;;  %s1009_s4 = inlined_call_operand.hbm [shape: f32[2,8,32], index: 4, kind: output, shape index: {}]  }
   0x1   :  { %1012 = sst [smem:[#allocation15_spill]] %s1006_s1 }
   0x2   :  { %9 = vsyncpa [#allocation6], 0 }
   0x3   :  { %11 = vsyncpa [#allocation6 + $0x1], 0 }
   0x4   :  { %12 = vsyncpa [#allocation9], 0 }
   0x5   :  { %13 = vsyncpa [#allocation7], 0 }
   0x6   :  { %15 = vsyncpa [#allocation7 + $0x1], 0  ;;  %s830_s15 = smov 0   ;;  %s832_s16 = smov 0  }
   0x7   :  { %s834_s17 = smov 0   ;;  %s836_s18 = smov 0  }
   0x8   :  { %s838_s19 = smov 0   ;;  %s840_s20 = smov 0  }
   0x9 LB: > { %1013 = sst [smem:[#allocation14_spill]] %s796_s20  ;;  %s533_s21 = sadd.s32 4294967295, %s796_s20   ;;  %s796_s20 = sphi %s840_s20, %s21_s20   ;;  %s792_s19 = sphi %s838_s19, %s1027_s19   ;;  %s788_s18 = sphi %s836_s18, %s1026_s18   ;;  %s784_s17 = sphi %s834_s17, %s1025_s17   ;;  %s780_s16 = sphi %s832_s16, %s1024_s16   ;;  %s776_s15 = sphi %s830_s15, %s1023_s15  }
   0xa   : > { %s534_s22 = sadd.s32 4294967294, %s796_s20   ;;  %s42_s23 = sadd.s32 1, %s784_s17 }
   0xb   : > { %p49_p0 = scmp.ne.s32.totalorder %s784_s17, %s780_s16  ;;  %p50_p1 = scmp.eq.s32.totalorder %s796_s20, 0 }
   0xc   : > { %p55_p2 = scmp.ne.s32.totalorder %s780_s16, %s776_s15  ;;  %p868_p3 = scmp.eq.s32.totalorder %s533_s21, 0 }
   0xd   : > { %p142_p4 = scmp.eq.s32.totalorder %s533_s21, 1  ;;  %p872_p5 = por %p50_p1, %p49_p0 }
   0xe   : > { %p148_p6 = scmp.eq.s32.totalorder %s534_s22, 1  ;;  %p878_p7 = por %p868_p3, %p55_p2 }
   0xf   : > { %p882_p8 = por %p142_p4, %p49_p0  ;;  %p535_p10 = scmp.ge.s32.totalorder %s796_s20, 1 }
  0x10   : > { %p886_p9 = por %p148_p6, %p55_p2  ;;  %p155_p11 = scmp.lt.s32.totalorder %s796_s20, 3 }
  0x11   : > { %s1019_s1 = sld [smem:[#allocation15_spill]]  ;;  %s798_s7 = smov [#allocation8]  }
  0x12   : > { %p895_p12 = pnand %p535_p10, %p155_p11  ;;  %s169_s8 = sshll.u32 %s798_s7, 4  ;;  %s170_s8 = int_to_ptr.vmem [resolvable:$true] %s169_s8 }
  0x13   : > { %p537_p13 = scmp.ge.s32.totalorder %s796_s20, 2  ;;  %p575_p1 = scmp.lt.s32.totalorder %s796_s20, 2 }
  0x14   : > { %p562_p0 = pneg %p895_p12  ;;  %s33_s10 = sadd.s32 1, %s792_s19 }
  0x15   : > { %p907_p4 = pnand %p575_p1, %p872_p5  ;;  %p35_p6 = scmp.ge.s32.totalorder %s33_s10, 2 }
  0x16   : > { %p563_p2 = pnand %p562_p0, %p868_p3  ;;  %s186_s11 = sand.u32 1, %s784_s17  }
  0x17   : > { %s167_s5 = sshll.u32 %s1019_s1, 4  ;;  %s1029_s10 = smov (%p35_p6, %s33_s10), 0  ;;  %s168_s5 = int_to_ptr.hbm [resolvable:$true] %s167_s5 }
  0x18   : > { %565 = dma.hbm_to_vmem [thread:$0]  (!%p563_p2), %s168_s5, 128, %s170_s8, [#allocation9]  }
  0x19   : > { %s538_s12 = sshll.u32 %s186_s11, 4  ;;  %s37_s13 = ssub.s32 %s792_s19, %s1029_s10 }
  0x1a   : > { %p40_p10 = scmp.eq.s32.totalorder %s37_s13, 0  ;;  %s553_s14 = sshll.u32 %s792_s19, 4 }
  0x1b   : > { %s197_s25 = scalar_lea.hbm %s1005_s0, %s553_s14  ;;  %s190_s29 = scalar_lea.vmem [#allocation5], %s538_s12 }
  0x1c   : > { %s200_s30 = sshll.u32 %s190_s29, 4  ;;  %s198_s1 = sshll.u32 %s197_s25, 4  ;;  %s201_s30 = int_to_ptr.vmem [resolvable:$true] %s200_s30  ;;  %s199_s1 = int_to_ptr.hbm [resolvable:$true] %s198_s1 }
  0x1d   : > { %s924_s7 = scalar_select %p40_p10, %s784_s17, %s42_s23  }
  0x1e   : > { %s187_s5 = scalar_lea.sflag [#allocation6], %s186_s11  ;;  %s799_s8 = smov 128  }
  0x1f   : > { %s800_s20 = smov 8   ;;  %212 = sbr.rel (%p895_p12) target bundleno = 920 (0x398), region = 36 }
  0x20   : > { %569 = dma.hbm_to_vmem [thread:$0]  (!%p907_p4), %s199_s1, 256, %s201_s30, %s187_s5, %s799_s8, %s799_s8, %s800_s20  }
  0x21   : > { %s931_s13 = sand.u32 (!%p895_p12), 1, %s780_s16  }
  0x22   : > { %s542_s12 = sshll.u32 (!%p895_p12), %s931_s13, 4  ;;  %s215_s23 = scalar_lea.sflag (!%p895_p12), [#allocation6], %s931_s13 }
  0x23   : > { %s218_s14 = scalar_lea.vmem (!%p895_p12), [#allocation5], %s542_s12 }
  0x24   : > { %763 = dma.done.wait (%p878_p7), %s215_s23, 256  }
  0x25   : > { %765 = vsyncadd (%p878_p7), %s215_s23, 4294967040 }
  0x26   : > { %767 = dma.done.wait (%p868_p3), [#allocation9], 128  }
  0x27   : > { %769 = vsyncadd (%p868_p3), [#allocation9], 4294967168  ;;  %vm257_vm0 = vcmask 261120   ;;  %v260_v0 = vld [vmem:[%s218_s14 + $0x8] sm:$0xff]  ;;  %v259_v2 = vld [vmem:[%s218_s14] sm:$0xff]  ;;  %v801_v4 = vmov 32.0  }
  0x28   : > { %v265_v1 = vsel %vm257_vm0, %v260_v0, 0.0  ;;  %v262_v3 = vsel %vm257_vm0, %v259_v2, 0.0  ;;  %638 = vrcp.f32 %v801_v4  ;;  %v636_v35 = vld [vmem:[%s1007_s2] ss:$0 sm:$0xff]  ;;  %v325_v49 = vld [vmem:[#allocation8] sm:$0xff]  ;;  %vm254_vm8 = vcmask 7168  }
  0x29   : > { %266 = vadd.xlane.f32.xlu0 %v265_v1  ;;  %v637_v39 = vld [vmem:[%s1008_s3] ss:$0 sm:$0xff]  ;;  %v802_v50 = vmov -inf   ;;  %vm356_vm9 = vcmask 130048   ;;  %v803_v53 = vmov 0   ;;  %v804_v54 = vmov 0.0  }
  0x2a   : > { %255 = vst.msk [vmem:[#allocation2] sm:$0xff] %vm254_vm8, %v802_v50  ;;  %633 = vset.pattern.permute.xlu2 %v803_v53  ;;  %634 = vset.pattern.permute.xlu1 %v803_v53  ;;  %s544_s6 = sshll.u32 %s931_s13, 3  ;;  %s550_s9 = sshll.u32 %s788_s18, 3 }
  0x2b   : > { %635 = vset.pattern.permute.xlu0 %v803_v53  ;;  %258 = vst.msk [vmem:[#allocation4] sm:$0xff] %vm257_vm0, %v804_v54  ;;  %s437_s22 = scalar_lea.hbm %s1009_s4, %s550_s9  ;;  %s248_s25 = scalar_lea.vmem [#allocation10], %s544_s6 }
  0x2c   : > { %256 = vst.msk [vmem:[#allocation3] sm:$0xff] %vm254_vm8, %v804_v54  ;;  %s439_s29 = sshll.u32 %s248_s25, 4  ;;  %s441_s30 = sshll.u32 %s437_s22, 4  ;;  %s440_s29 = int_to_ptr.vmem [resolvable:$true] %s439_s29  ;;  %s442_s30 = int_to_ptr.hbm [resolvable:$true] %s441_s30 }
  0x2d   : > { %s427_s5 = scalar_lea.sflag [#allocation7], %s931_s13  ;;  %s724_s8 = sshra.s32 %s442_s30, 4  ;;  %s725_s8 = int_to_ptr.hbm [resolvable:$true] %s724_s8 }
  0x2e   : > { %v639_v5 = vpop.eup %638  ;;  %s726_s12 = scalar_lea.hbm %s725_s8, 8  ;;  %s730_s14 = scalar_lea.hbm %s1009_s4, 16 }
  0x2f   : > { %v269_v6 = vmul.f32 32.0, %v639_v5  ;;  %vm273_vm1 = vweird.f32 %v639_v5  ;;  %p727_p3 = scmp.ne.s32.totalorder %s725_s8, %s726_s12  ;;  %p731_p11 = scmp.lt.s32.totalorder %s725_s8, %s1009_s4 }
  0x30   : > { %p732_p12 = scmp.lt.s32.totalorder %s730_s14, %s726_s12 }
  0x31   : > { %263 = vadd.xlane.f32.xlu0 %v262_v3  ;;  %v270_v7 = vsub.f32 1.0, %v269_v6  ;;  %v355_v55 = vld [vmem:[#allocation2] sm:$0xff]  ;;  %p728_p5 = pnand %p727_p3, %p882_p8 }
  0x32   : > { %v380_v6 = vld [vmem:[#allocation4] sm:$0xff]  ;;  %p733_p0 = por %p732_p12, %p731_p11 }
  0x33   : > { %v271_v8 = vmul.f32 %v639_v5, %v270_v7  ;;  %p729_p7 = pneg %p728_p5 }
  0x35   : > { %v272_v9 = vadd.f32 %v639_v5, %v271_v8  ;;  %p734_p1 = pnand %p733_p0, %p729_p7 }
  0x37   : > { %v274_v10 = vsel %vm273_vm1, %v639_v5, %v272_v9 }
  0x9c   : > { %v267_v11 = vpop.xlane.xlu0 %266 }
  0x9d   : > { %v276_v12 = vmul.f32 %v274_v10, %v267_v11 }
  0x9f   : > { %v278_v13 = vsub.f32 %v260_v0, %v276_v12 }
  0xa1   : > { %v280_v14 = vmul.f32 %v278_v13, %v278_v13 }
  0xa3   : > { %v284_v15 = vsel %vm257_vm0, %v280_v14, 0.0 }
  0xa4   : > { %285 = vadd.xlane.f32.xlu1 %v284_v15  ;;  %v264_v16 = vpop.xlane.xlu0 %263 }
  0xa5   : > { %v275_v17 = vmul.f32 %v274_v10, %v264_v16 }
  0xa7   : > { %v277_v18 = vsub.f32 %v259_v2, %v275_v17  ;;  %v372_v2 = vld [vmem:[#allocation3] sm:$0xff] }
  0xa9   : > { %v279_v19 = vmul.f32 %v277_v18, %v277_v18 }
  0xab   : > { %v281_v20 = vsel %vm257_vm0, %v279_v19, 0.0 }
  0xac   : > { %282 = vadd.xlane.f32.xlu1 %v281_v20 }
 0x117   : > { %v286_v21 = vpop.xlane.xlu1 %285 }
 0x118   : > { %v288_v22 = vmul.f32 %v286_v21, %v274_v10 }
 0x11a   : > { %v290_v23 = vadd.f32 1e-05, %v288_v22 }
 0x11c   : > { %640 = vrsqrt.f32 %v290_v23  ;;  %vm307_vm3 = vweird.f32 %v290_v23 }
 0x11f   : > { %v283_v24 = vpop.xlane.xlu1 %282 }
 0x120   : > { %v287_v25 = vmul.f32 %v283_v24, %v274_v10 }
 0x122   : > { %v641_v26 = vpop.eup %640  ;;  %v289_v27 = vadd.f32 1e-05, %v287_v25 }
 0x123   : > { %v302_v28 = vmul.f32 %v641_v26, %v290_v23  ;;  %vm308_vm2 = vweird.f32 %v641_v26 }
 0x124   : > { %642 = vrsqrt.f32 %v289_v27  ;;  %vm309_vm4 = vmor %vm307_vm3, %vm308_vm2  ;;  %vm297_vm6 = vweird.f32 %v289_v27 }
 0x125   : > { %v303_v29 = vmul.f32 %v641_v26, %v302_v28 }
 0x127   : > { %v304_v30 = vmul.f32 0.5, %v303_v29 }
 0x129   : > { %v305_v31 = vsub.f32 1.5, %v304_v30 }
 0x12a   : > { %v643_v32 = vpop.eup %642 }
 0x12b   : > { %v306_v33 = vmul.f32 %v641_v26, %v305_v31  ;;  %v292_v34 = vmul.f32 %v643_v32, %v289_v27  ;;  %vm298_vm5 = vweird.f32 %v643_v32 }
 0x12c   : > { %vm299_vm7 = vmor %vm297_vm6, %vm298_vm5 }
 0x12d   : > { %v293_v36 = vmul.f32 %v643_v32, %v292_v34  ;;  %v310_v37 = vsel %vm309_vm4, %v641_v26, %v306_v33 }
 0x12e   : > { %v312_v38 = vmul.f32 %v310_v37, %v278_v13 }
 0x12f   : > { %v294_v40 = vmul.f32 0.5, %v293_v36 }
 0x130   : > { %v318_v41 = vmul.f32 %v636_v35, %v312_v38 }
 0x131   : > { %v295_v42 = vsub.f32 1.5, %v294_v40 }
 0x132   : > { %v324_v43 = vadd.f32 %v637_v39, %v318_v41 }
 0x133   : > { %v296_v44 = vmul.f32 %v643_v32, %v295_v42 }
 0x134   : > { %545 = vmatpush.xpose.msk.msra.mxu0 %vm257_vm0, %v324_v43  ;;  %404 = vmatpush.msra.mxu1 %v324_v43 }
 0x135   : > { %v300_v45 = vsel %vm299_vm7, %v643_v32, %v296_v44 }
 0x136   : > { %v311_v46 = vmul.f32 %v300_v45, %v277_v18 }
 0x138   : > { %v317_v47 = vmul.f32 %v636_v35, %v311_v46 }
 0x13a   : > { %v323_v48 = vadd.f32 %v637_v39, %v317_v47 }
 0x13c   : > { %546 = vmatpush.xpose.msk.msra.mxu0 %vm257_vm0, %v323_v48  ;;  %405 = vmatpush.msra.mxu1 %v323_v48 }
 0x13f   : > { %547 = vmatmul.msk.f32.vlgmr.msra.gmra.mxu0 %vm257_vm0, %v325_v49 }
 0x1bc   : > { %v352_v51 = vpop.f32.mrf.mxu0 }
 0x1bd   : > { %v357_v52 = vsel %vm356_vm9, %v352_v51, -inf }
 0x1be   : > { %358 = vmax.xlane.f32.xlu2 %v357_v52 }
 0x231   : > { %v359_v56 = vpop.xlane.xlu2 %358 }
 0x232   : > { %v360_v57 = vmax.f32 %v355_v55, %v359_v56 }
 0x234   : > { %v361_v58 = vsub.f32 %v355_v55, %v360_v57  ;;  %412 = vst.msk [vmem:[#allocation2] sm:$0xff] %vm254_vm8, %v360_v57  ;;  %366 = vperm.xlu2 %633, %v360_v57  }
 0x236   : > { %v362_v59 = vmul.f32 1.442695, %v361_v58 }
 0x238   : > { %644 = vpow2.f32 %v362_v59 }
 0x23e   : > { %v645_v60 = vpop.eup %644 }
 0x23f   : > { %383 = vperm.xlu1 %634, %v645_v60   ;;  %v373_v3 = vmul.f32 %v645_v60, %v372_v2 }
 0x28e   : > { %v367_v61 = vpop.permute.xlu2 %366 }
 0x28f   : > { %v369_v62 = vsub.f32 %v352_v51, %v367_v61 }
 0x291   : > { %v370_v63 = vmul.f32 1.442695, %v369_v62 }
 0x293   : > { %646 = vpow2.f32 %v370_v63 }
 0x299   : > { %v647_v0 = vpop.eup %646 }
 0x29a   : > { %548 = vmatmul.msk.f32.vlgmr.msra.gmra.mxu1 %vm356_vm9, %v647_v0  ;;  %v374_v1 = vsel %vm356_vm9, %v647_v0, 0.0 }
 0x29b   : > { %375 = vadd.xlane.f32.xlu0 %v374_v1 }
 0x2b1   : > { %v384_v7 = vpop.permute.xlu1 %383 }
 0x2b2   : > { %v386_v8 = vmul.f32 %v384_v7, %v380_v6 }
 0x30e   : > { %v376_v4 = vpop.xlane.xlu0 %375 }
 0x30f   : > { %v377_v5 = vadd.f32 %v376_v4, %v373_v3 }
 0x311   : > { %379 = vst.msk [vmem:[#allocation3] sm:$0xff] %vm254_vm8, %v377_v5 }
 0x317   : > { %v407_v9 = vpop.f32.mrf.mxu1 }
 0x318   : > { %v410_v10 = vadd.f32 %v407_v9, %v386_v8  ;;  %v417_v11 = vld [vmem:[#allocation3] sm:$0xff] }
 0x319   : > { %648 = vrcp.f32 %v417_v11 }
 0x31a   : > { %411 = vst.msk [vmem:[#allocation4] sm:$0xff] %vm257_vm0, %v410_v10 }
 0x31f   : > { %v649_v12 = vpop.eup %648 }
 0x320   : > { %421 = vperm.xlu0 %635, %v649_v12  }
 0x321   : > { %v416_v13 = vld [vmem:[#allocation4] sm:$0xff] }
 0x392   : > { %v422_v14 = vpop.permute.xlu0 %421 }
 0x393   : > { %v424_v15 = vmul.f32 %v422_v14, %v416_v13 }
 0x395   : > { %425 = vst.msk [vmem:[%s248_s25] sm:$0xff] %vm257_vm0, %v424_v15 }
 0x396   : > { %737 = shalt.err (!%p734_p1)
}
 0x397   : > { %560 = dma.vmem_to_hbm [thread:$0]  (%p882_p8), %s440_s29, 128, %s442_s30, %s427_s5  }
 0x398 PF: > { %s1022_s13 = sld [smem:[#allocation14_spill]]  ;;  %s453_s24 = sand.u32 1, %s776_s15  }
 0x399   : > { %p571_p2 = pnand %p537_p13, %p886_p9  ;;  %s454_s26 = scalar_lea.sflag [#allocation7], %s453_s24 }
 0x39b   : > { %p572_p4 = pneg %p571_p2 }
 0x39d   : > { %771 = dma.done.wait (%p572_p4), %s454_s26, 128  }
 0x39e   : > { %773 = vsyncadd (%p572_p4), %s454_s26, 4294967168  ;;  %s21_s20 = sadd.s32 1, %s1022_s13   ;;  %s1023_s15 = smov %s780_s16 }
 0x39f   : > { %p18_p6 = scmp.ge.s32.totalorder %s21_s20, 4   ;;  %s1024_s16 = smov %s784_s17 }
 0x3a0   : > { %s1025_s17 = smov %s924_s7  ;;  %s1026_s18 = smov %s792_s19 }
 0x3a1   : > { %s1027_s19 = smov %s1029_s10  ;;  %20 = sbr.rel (!%p18_p6) target bundleno = 9 (0x9), region = 93 }
 0x3a6   :  { %460 = vsyncpa [#allocation6], 1 }
 0x3a7   :  { %462 = vsyncpa [#allocation6 + $0x1], 1 }
 0x3a8   :  { %463 = vsyncpa [#allocation9], 1 }
 0x3a9   :  { %464 = vsyncpa [#allocation7], 1 }
 0x3aa   :  { %466 = vsyncpa [#allocation7 + $0x1], 1 }

</bundles_post_ra>
